<compile_context>
chip_gen: v5e
topology: v5e:2x2
jax: 0.10.0
libtpu: 0.0.40
codegen_flags: <defaults>
</compile_context>

<pallas_src>
import functools

import numpy as np
import jax
import jax.numpy as jnp
from jax.experimental import pallas as pl
from jax.experimental.pallas import tpu as pltpu


def _nnstack_seq_kernel(scal_ref,      # SMEM (B*T*2,)    [dt, ut] per (b, s)
                        stg0_ref,      # SMEM (B*T_max,)  initial strengths (zero-padded)
                        val0_ref,      # VMEM (1, T_max, m) initial stack (zero-padded)
                        vt_ref,        # VMEM (1, 1, 1, m)  value pushed this step
                        val_ref,       # VMEM (1, T_max, m) OUT: stack (resident over s)
                        stg_ref,       # VMEM (1, 1, T_max) OUT: final strengths
                        rt_ref,        # VMEM (1, 1, 1, m)  OUT: read vector this step
                        stg_state,     # SMEM (T_max,) scratch: current strengths
                        *, T_max, depth0):
    b = pl.program_id(0)
    s = pl.program_id(1)
    T = pl.num_programs(1)
    m = val_ref.shape[-1]
    zero = jnp.float32(0.0)

    # ---- batch start: materialize the initial stack ONCE (not per step) -----
    @pl.when(s == 0)
    def _init():
        val_ref[...] = val0_ref[...]
        for i in range(T_max):
            stg_state[i] = stg0_ref[b * T_max + i]

    depth = depth0 + s                      # rows currently on the stack
    sb = (b * T + s) * 2
    dt = scal_ref[sb]                       # push strength
    ut = scal_ref[sb + 1]                   # pop strength

    # ---- push: Val[depth] = vt (one (1, m) dynamic-row store) ---------------
    vt = vt_ref[...].reshape(1, m)
    val_ref[0, pl.ds(depth, 1), :] = vt

    # ---- fused pop-strength recurrence + read pass (descending, unrolled) ---
    # Rows at or above `depth` are masked off on the scalar path (their coef
    # comes out 0; pad rows of Val are zeros so 0*row stays finite).
    read = jnp.float32(1.0)
    rt = jnp.minimum(dt, jnp.maximum(zero, read)) * vt       # pushed row first
    read = read - dt
    u = ut
    new_stg = [zero] * T_max
    for i in range(T_max - 1, -1, -1):
        active = i < depth
        s_new = jnp.where(
            active,
            jnp.maximum(zero, stg_state[i] - jnp.maximum(zero, u)),
            zero)
        u = u - s_new
        coef = jnp.minimum(s_new, jnp.maximum(zero, read))   # 0 when inactive
        read = read - s_new
        rt = rt + coef * val_ref[0, i:i + 1, :]              # static row slice
        stg_state[i] = s_new
        new_stg[i] = s_new
    stg_state[depth] = dt                   # freshly pushed strength

    rt_ref[...] = rt.reshape(rt_ref.shape)

    # ---- final strengths, emitted once per batch at the last step -----------
    @pl.when(s == T - 1)
    def _emit_stg():
        lane = jax.lax.broadcasted_iota(jnp.int32, (1, 1, T_max), 2)
        row = jnp.zeros((1, 1, T_max), jnp.float32)
        for i in range(T_max):
            row = jnp.where(lane == i, new_stg[i], row)
        row = jnp.where(lane == depth, dt, row)
        stg_ref[...] = row


def nnstack_sequence(Val0, stg0, dts, uts, vts, *, T_max):
    """Run T NNstack steps for B independent stacks in ONE pallas_call.

    Val0: (B, depth0, m)  initial stack contents (depth0 may be 0)
    stg0: (B, depth0)     initial strengths
    dts, uts: (B, T)      push / pop strengths per step
    vts: (B, T, m)        values pushed per step
    T_max: fixed stack capacity, depth0 + T <= T_max

    Returns (Val, stg, rts):
      Val: (B, T_max, m) final stack, rows [0, depth0+T) valid
      stg: (B, T_max)    final strengths, entries [0, depth0+T) valid
      rts: (B, T, m)     read vector produced at every step
    """
    Val0 = jnp.asarray(Val0, jnp.float32)
    stg0 = jnp.asarray(stg0, jnp.float32)
    dts = jnp.asarray(dts, jnp.float32)
    uts = jnp.asarray(uts, jnp.float32)
    vts = jnp.asarray(vts, jnp.float32)

    B, T, m = vts.shape
    depth0 = Val0.shape[1]
    assert Val0.shape == (B, depth0, m) and stg0.shape == (B, depth0)
    assert dts.shape == (B, T) and uts.shape == (B, T)
    assert depth0 + T <= T_max, "stack capacity T_max too small"

    # Fixed-capacity, zero-padded state buffers.  Pad rows MUST stay finite:
    # the kernel reads them with a 0 coefficient.
    val0 = jnp.zeros((B, T_max, m), jnp.float32).at[:, :depth0, :].set(Val0)
    stg0_full = jnp.zeros((B, T_max), jnp.float32).at[:, :depth0].set(stg0)

    # Merge all per-step scalars into one SMEM array: [dt, ut] per (b, s).
    scal = jnp.stack([dts, uts], axis=-1).reshape(B * T * 2)
    stg0_flat = stg0_full.reshape(B * T_max)
    vts4 = vts.reshape(B, T, 1, m)

    grid_spec = pltpu.PrefetchScalarGridSpec(
        num_scalar_prefetch=0,
        grid=(B, T),
        in_specs=[
            pl.BlockSpec(memory_space=pltpu.MemorySpace.SMEM),       # scal
            pl.BlockSpec(memory_space=pltpu.MemorySpace.SMEM),       # stg0
            pl.BlockSpec((1, T_max, m), lambda b, s: (b, 0, 0)),     # val0
            pl.BlockSpec((1, 1, 1, m), lambda b, s: (b, s, 0, 0)),   # vts
        ],
        out_specs=(
            pl.BlockSpec((1, T_max, m), lambda b, s: (b, 0, 0)),     # Val
            pl.BlockSpec((1, 1, T_max), lambda b, s: (b, 0, 0)),     # stg
            pl.BlockSpec((1, 1, 1, m), lambda b, s: (b, s, 0, 0)),   # rts
        ),
        scratch_shapes=[pltpu.SMEM((T_max,), jnp.float32)],
    )
    out_shapes = (
        jax.ShapeDtypeStruct((B, T_max, m), jnp.float32),
        jax.ShapeDtypeStruct((B, 1, T_max), jnp.float32),
        jax.ShapeDtypeStruct((B, T, 1, m), jnp.float32),
    )
    kernel = functools.partial(_nnstack_seq_kernel, T_max=T_max, depth0=depth0)

    # Per-core VMEM residency here is tiny (2 * T_max*m*4 B + a few (1, m)
    # blocks).  When scaling B*T_max*m up, budget against v7x's 64 MiB
    # physical / 32 MiB default-scoped VMEM (review note).
    Val, stg, rts = pl.pallas_call(
        kernel,
        out_shape=out_shapes,
        grid_spec=grid_spec,
        input_output_aliases={2: 0},    # Val buffer is updated in place
        compiler_params=pltpu.CompilerParams(
            dimension_semantics=("parallel", "arbitrary")),
    )(scal, stg0_flat, val0, vts4)

    return Val, stg.reshape(B, T_max), rts.reshape(B, T, m)


def nnstack_forward(prev_Val, prev_stg, dt, ut, vt):
    """Drop-in equivalent of NNstack.forward (single step).

    NOTE: this API grows Val by one row per call which forces one compile per
    distinct stack depth; prefer nnstack_sequence for whole sequences.
    """
    prev_Val = jnp.asarray(prev_Val, jnp.float32)
    prev_stg = jnp.asarray(prev_stg, jnp.float32)
    t_1, m = prev_Val.shape
    t = t_1 + 1
    T_max = ((t + 7) // 8) * 8
    vt_row = jnp.asarray(vt, jnp.float32).reshape(1, 1, m)
    Val, stg, rts = nnstack_sequence(
        prev_Val[None], prev_stg[None],
        jnp.asarray(dt, jnp.float32).reshape(1, 1),
        jnp.asarray(ut, jnp.float32).reshape(1, 1),
        vt_row, T_max=T_max)
    return (Val[0, :t], stg[0, :t]), rts[0, 0]


# ----------------------------- numpy reference -------------------------------
def _reference_step(prev_Val, prev_stg, dt, ut, vt_row):
    """Exact transcription of the torch forward for one step."""
    prev_Val = np.asarray(prev_Val, np.float32)
    prev_stg = np.asarray(prev_stg, np.float32)
    vt_row = np.asarray(vt_row, np.float32).reshape(1, -1)
    t_1 = prev_Val.shape[0]
    m = vt_row.shape[1]
    t = t_1 + 1
    Val = np.concatenate([prev_Val.reshape(t_1, m), vt_row], axis=0)
    stg = np.zeros(t, np.float32)
    stg[t - 1] = float(dt)
    u = float(ut)
    for i in range(t_1 - 1, -1, -1):
        stg[i] = max(0.0, prev_stg[i] - max(0.0, u))
        u = u - stg[i]
    rt = np.zeros(m, np.float32)
    read = 1.0
    for i in range(t - 1, -1, -1):
        coef = min(stg[i], max(0.0, read))
        rt = rt + coef * Val[i]
        read = read - stg[i]
    return Val, stg, rt


def _check_sequence(Val0, stg0, dts, uts, vts, Val_f, stg_f, rts):
    B, T, m = np.asarray(vts).shape
    depth0 = np.asarray(Val0).shape[1]
    for b in range(B):
        V = np.asarray(Val0[b], np.float32).reshape(depth0, m)
        S = np.asarray(stg0[b], np.float32).reshape(depth0)
        for s in range(T):
            V, S, r = _reference_step(V, S, float(dts[b, s]), float(uts[b, s]),
                                      np.asarray(vts[b, s]).reshape(1, m))
            assert np.allclose(np.asarray(rts[b, s]), r, atol=1e-5, rtol=1e-5)
        d = depth0 + T
        assert np.allclose(np.asarray(Val_f[b, :d]), V, atol=1e-5, rtol=1e-5)
        assert np.allclose(np.asarray(stg_f[b, :d]), S, atol=1e-5, rtol=1e-5)


if __name__ == "__main__":
    key = jax.random.PRNGKey(0)
    ks = jax.random.split(key, 12)
    m = 128   # lane-dense value dim -> unmasked full-width stores

    # ---- Case A: batched sequence, non-empty initial stack ------------------
    B, depth0, T, T_max = 2, 3, 5, 8
    Val0 = jax.random.normal(ks[0], (B, depth0, m), jnp.float32)
    stg0 = jax.random.uniform(ks[1], (B, depth0), jnp.float32)
    dts = jax.random.uniform(ks[2], (B, T), jnp.float32)
    uts = jax.random.uniform(ks[3], (B, T), jnp.float32)
    vts = jax.random.normal(ks[4], (B, T, m), jnp.float32)
    Val_f, stg_f, rts = nnstack_sequence(Val0, stg0, dts, uts, vts, T_max=T_max)
    jax.block_until_ready((Val_f, stg_f, rts))
    _check_sequence(Val0, stg0, dts, uts, vts, Val_f, stg_f, rts)

    # ---- Case B: empty initial stack (t_1 == 0), fill to capacity -----------
    Bb, Tb, T_maxb = 1, 8, 8
    Val0b = jnp.zeros((Bb, 0, m), jnp.float32)
    stg0b = jnp.zeros((Bb, 0), jnp.float32)
    dtsb = jax.random.uniform(ks[5], (Bb, Tb), jnp.float32)
    utsb = jax.random.uniform(ks[6], (Bb, Tb), jnp.float32)
    vtsb = jax.random.normal(ks[7], (Bb, Tb, m), jnp.float32)
    Val_fb, stg_fb, rtsb = nnstack_sequence(Val0b, stg0b, dtsb, utsb, vtsb,
                                            T_max=T_maxb)
    jax.block_until_ready((Val_fb, stg_fb, rtsb))
    _check_sequence(Val0b, stg0b, dtsb, utsb, vtsb, Val_fb, stg_fb, rtsb)

    # ---- Case C: module-compatible single-step API ---------------------------
    t_1 = 7
    pV = jax.random.normal(ks[8], (t_1, m), jnp.float32)
    pS = jax.random.uniform(ks[9], (t_1,), jnp.float32)
    dt1 = jax.random.uniform(ks[10], (), jnp.float32)
    ut1 = jax.random.uniform(ks[11], (), jnp.float32)
    vt1 = jax.random.normal(ks[0], (1, 1, m), jnp.float32)
    (Val1, stg1), rt1 = nnstack_forward(pV, pS, dt1, ut1, vt1)
    jax.block_until_ready((Val1, stg1, rt1))
    Vr, Sr, rr = _reference_step(pV, pS, float(dt1), float(ut1),
                                 np.asarray(vt1).reshape(1, m))
    assert np.allclose(np.asarray(Val1), Vr, atol=1e-5, rtol=1e-5)
    assert np.allclose(np.asarray(stg1), Sr, atol=1e-5, rtol=1e-5)
    assert np.allclose(np.asarray(rt1), rr, atol=1e-5, rtol=1e-5)

    print("KERNEL_OK")
</pallas_src>

<mosaic_0001>
module attributes {stable_mosaic.version = 11 : i64} {
  func.func @_nnstack_seq_kernel(%arg0: i32, %arg1: i32, %arg2: memref<20xf32, #tpu.memory_space<smem>>, %arg3: memref<16xf32, #tpu.memory_space<smem>>, %arg4: memref<1x8x128xf32, #tpu.memory_space<vmem>>, %arg5: memref<1x1x1x128xf32, #tpu.memory_space<vmem>>, %arg6: memref<1x8x128xf32, #tpu.memory_space<vmem>>, %arg7: memref<1x1x8xf32, #tpu.memory_space<vmem>>, %arg8: memref<1x1x1x128xf32, #tpu.memory_space<vmem>>, %arg9: memref<8xf32, #tpu.memory_space<smem>>) attributes {dimension_semantics = [#tpu.dimension_semantics<parallel>, #tpu.dimension_semantics<arbitrary>], iteration_bounds = array<i64: 2, 5>, scalar_prefetch = 0 : i64, scratch_operands = 1 : i64, tpu.core_type = #tpu.core_type<tc>, window_params = [{transform_indices = @transform_0, window_bounds = array<i64: 20>}, {transform_indices = @transform_1, window_bounds = array<i64: 16>}, {transform_indices = @transform_2, window_bounds = array<i64: 1, 8, 128>}, {transform_indices = @transform_3, window_bounds = array<i64: 1, 1, 1, 128>}, {transform_indices = @transform_4, window_bounds = array<i64: 1, 8, 128>}, {transform_indices = @transform_5, window_bounds = array<i64: 1, 1, 8>}, {transform_indices = @transform_6, window_bounds = array<i64: 1, 1, 1, 128>}]} {
    %c0_i32 = arith.constant 0 : i32
    %0 = arith.cmpi eq, %arg1, %c0_i32 : i32
    %1 = arith.extui %0 : i1 to i32
    %c0_i32_0 = arith.constant 0 : i32
    %2 = arith.cmpi ne, %1, %c0_i32_0 : i32
    scf.if %2 {
      %c0_84 = arith.constant 0 : index
      %c0_85 = arith.constant 0 : index
      %c0_86 = arith.constant 0 : index
      %156 = vector.load %arg4[%c0_84, %c0_85, %c0_86] : memref<1x8x128xf32, #tpu.memory_space<vmem>>, vector<1x8x128xf32>
      %c0_87 = arith.constant 0 : index
      %c0_88 = arith.constant 0 : index
      %c0_89 = arith.constant 0 : index
      %157 = vector.load %arg6[%c0_87, %c0_88, %c0_89] : memref<1x8x128xf32, #tpu.memory_space<vmem>>, vector<1x8x128xf32>
      tpu.vector_store %arg6[%c0_87, %c0_88, %c0_89], %156 {strides = array<i32>} : memref<1x8x128xf32, #tpu.memory_space<vmem>>, vector<1x8x128xf32>,
      %c8_i32 = arith.constant 8 : i32
      %158 = arith.muli %arg0, %c8_i32 : i32
      %c0_i32_90 = arith.constant 0 : i32
      %159 = arith.addi %158, %c0_i32_90 : i32
      %160 = arith.index_cast %159 : i32 to index
      %161 = memref.load %arg3[%160] : memref<16xf32, #tpu.memory_space<smem>>
      %c0_91 = arith.constant 0 : index
      %162 = memref.load %arg9[%c0_91] : memref<8xf32, #tpu.memory_space<smem>>
      memref.store %161, %arg9[%c0_91] : memref<8xf32, #tpu.memory_space<smem>>
      %c8_i32_92 = arith.constant 8 : i32
      %163 = arith.muli %arg0, %c8_i32_92 : i32
      %c1_i32_93 = arith.constant 1 : i32
      %164 = arith.addi %163, %c1_i32_93 : i32
      %165 = arith.index_cast %164 : i32 to index
      %166 = memref.load %arg3[%165] : memref<16xf32, #tpu.memory_space<smem>>
      %c1_94 = arith.constant 1 : index
      %167 = memref.load %arg9[%c1_94] : memref<8xf32, #tpu.memory_space<smem>>
      memref.store %166, %arg9[%c1_94] : memref<8xf32, #tpu.memory_space<smem>>
      %c8_i32_95 = arith.constant 8 : i32
      %168 = arith.muli %arg0, %c8_i32_95 : i32
      %c2_i32_96 = arith.constant 2 : i32
      %169 = arith.addi %168, %c2_i32_96 : i32
      %170 = arith.index_cast %169 : i32 to index
      %171 = memref.load %arg3[%170] : memref<16xf32, #tpu.memory_space<smem>>
      %c2_97 = arith.constant 2 : index
      %172 = memref.load %arg9[%c2_97] : memref<8xf32, #tpu.memory_space<smem>>
      memref.store %171, %arg9[%c2_97] : memref<8xf32, #tpu.memory_space<smem>>
      %c8_i32_98 = arith.constant 8 : i32
      %173 = arith.muli %arg0, %c8_i32_98 : i32
      %c3_i32_99 = arith.constant 3 : i32
      %174 = arith.addi %173, %c3_i32_99 : i32
      %175 = arith.index_cast %174 : i32 to index
      %176 = memref.load %arg3[%175] : memref<16xf32, #tpu.memory_space<smem>>
      %c3_100 = arith.constant 3 : index
      %177 = memref.load %arg9[%c3_100] : memref<8xf32, #tpu.memory_space<smem>>
      memref.store %176, %arg9[%c3_100] : memref<8xf32, #tpu.memory_space<smem>>
      %c8_i32_101 = arith.constant 8 : i32
      %178 = arith.muli %arg0, %c8_i32_101 : i32
      %c4_i32_102 = arith.constant 4 : i32
      %179 = arith.addi %178, %c4_i32_102 : i32
      %180 = arith.index_cast %179 : i32 to index
      %181 = memref.load %arg3[%180] : memref<16xf32, #tpu.memory_space<smem>>
      %c4_103 = arith.constant 4 : index
      %182 = memref.load %arg9[%c4_103] : memref<8xf32, #tpu.memory_space<smem>>
      memref.store %181, %arg9[%c4_103] : memref<8xf32, #tpu.memory_space<smem>>
      %c8_i32_104 = arith.constant 8 : i32
      %183 = arith.muli %arg0, %c8_i32_104 : i32
      %c5_i32_105 = arith.constant 5 : i32
      %184 = arith.addi %183, %c5_i32_105 : i32
      %185 = arith.index_cast %184 : i32 to index
      %186 = memref.load %arg3[%185] : memref<16xf32, #tpu.memory_space<smem>>
      %c5_106 = arith.constant 5 : index
      %187 = memref.load %arg9[%c5_106] : memref<8xf32, #tpu.memory_space<smem>>
      memref.store %186, %arg9[%c5_106] : memref<8xf32, #tpu.memory_space<smem>>
      %c8_i32_107 = arith.constant 8 : i32
      %188 = arith.muli %arg0, %c8_i32_107 : i32
      %c6_i32_108 = arith.constant 6 : i32
      %189 = arith.addi %188, %c6_i32_108 : i32
      %190 = arith.index_cast %189 : i32 to index
      %191 = memref.load %arg3[%190] : memref<16xf32, #tpu.memory_space<smem>>
      %c6_109 = arith.constant 6 : index
      %192 = memref.load %arg9[%c6_109] : memref<8xf32, #tpu.memory_space<smem>>
      memref.store %191, %arg9[%c6_109] : memref<8xf32, #tpu.memory_space<smem>>
      %c8_i32_110 = arith.constant 8 : i32
      %193 = arith.muli %arg0, %c8_i32_110 : i32
      %c7_i32_111 = arith.constant 7 : i32
      %194 = arith.addi %193, %c7_i32_111 : i32
      %195 = arith.index_cast %194 : i32 to index
      %196 = memref.load %arg3[%195] : memref<16xf32, #tpu.memory_space<smem>>
      %c7_112 = arith.constant 7 : index
      %197 = memref.load %arg9[%c7_112] : memref<8xf32, #tpu.memory_space<smem>>
      memref.store %196, %arg9[%c7_112] : memref<8xf32, #tpu.memory_space<smem>>
    } else {
    }
    %c3_i32 = arith.constant 3 : i32
    %3 = arith.addi %c3_i32, %arg1 : i32
    %c5_i32 = arith.constant 5 : i32
    %4 = arith.muli %arg0, %c5_i32 : i32
    %5 = arith.addi %4, %arg1 : i32
    %c2_i32 = arith.constant 2 : i32
    %6 = arith.muli %5, %c2_i32 : i32
    %7 = arith.index_cast %6 : i32 to index
    %8 = memref.load %arg2[%7] : memref<20xf32, #tpu.memory_space<smem>>
    %c1_i32 = arith.constant 1 : i32
    %9 = arith.addi %6, %c1_i32 : i32
    %10 = arith.index_cast %9 : i32 to index
    %11 = memref.load %arg2[%10] : memref<20xf32, #tpu.memory_space<smem>>
    %c0 = arith.constant 0 : index
    %c0_1 = arith.constant 0 : index
    %c0_2 = arith.constant 0 : index
    %c0_3 = arith.constant 0 : index
    %12 = vector.load %arg5[%c0, %c0_1, %c0_2, %c0_3] : memref<1x1x1x128xf32, #tpu.memory_space<vmem>>, vector<1x1x1x128xf32>
    %13 = vector.shape_cast %12 : vector<1x1x1x128xf32> to vector<1x128xf32>
    %c0_4 = arith.constant 0 : index
    %14 = arith.index_cast %3 : i32 to index
    %c0_5 = arith.constant 0 : index
    %15 = vector.load %arg6[%c0_4, %14, %c0_5] : memref<1x8x128xf32, #tpu.memory_space<vmem>>, vector<1x1x128xf32>
    %16 = vector.shape_cast %15 : vector<1x1x128xf32> to vector<1x128xf32>
    %17 = vector.shape_cast %13 : vector<1x128xf32> to vector<1x1x128xf32>
    tpu.vector_store %arg6[%c0_4, %14, %c0_5], %17 {strides = array<i32>} : memref<1x8x128xf32, #tpu.memory_space<vmem>>, vector<1x1x128xf32>,
    %cst = arith.constant 0.000000e+00 : f32
    %cst_6 = arith.constant 1.000000e+00 : f32
    %18 = arith.maximumf %cst, %cst_6 : f32
    %19 = arith.minimumf %8, %18 : f32
    %20 = vector.broadcast %19 : f32 to vector<1x128xf32>
    %21 = arith.mulf %20, %13 : vector<1x128xf32>
    %cst_7 = arith.constant 1.000000e+00 : f32
    %22 = arith.subf %cst_7, %8 : f32
    %c7_i32 = arith.constant 7 : i32
    %23 = arith.cmpi sgt, %3, %c7_i32 : i32
    %c7 = arith.constant 7 : index
    %24 = memref.load %arg9[%c7] : memref<8xf32, #tpu.memory_space<smem>>
    %cst_8 = arith.constant 0.000000e+00 : f32
    %25 = arith.maximumf %cst_8, %11 : f32
    %26 = arith.subf %24, %25 : f32
    %cst_9 = arith.constant 0.000000e+00 : f32
    %27 = arith.maximumf %cst_9, %26 : f32
    %cst_10 = arith.constant 0.000000e+00 : f32
    %28 = arith.select %23, %27, %cst_10 : f32
    %29 = arith.subf %11, %28 : f32
    %cst_11 = arith.constant 0.000000e+00 : f32
    %30 = arith.maximumf %cst_11, %22 : f32
    %31 = arith.minimumf %28, %30 : f32
    %32 = arith.subf %22, %28 : f32
    %c0_12 = arith.constant 0 : index
    %c7_13 = arith.constant 7 : index
    %c0_14 = arith.constant 0 : index
    %33 = vector.load %arg6[%c0_12, %c7_13, %c0_14] : memref<1x8x128xf32, #tpu.memory_space<vmem>>, vector<1x1x128xf32>
    %34 = vector.shape_cast %33 : vector<1x1x128xf32> to vector<1x128xf32>
    %35 = vector.broadcast %31 : f32 to vector<1x128xf32>
    %36 = arith.mulf %35, %34 : vector<1x128xf32>
    %37 = arith.addf %21, %36 : vector<1x128xf32>
    %c7_15 = arith.constant 7 : index
    %38 = memref.load %arg9[%c7_15] : memref<8xf32, #tpu.memory_space<smem>>
    memref.store %28, %arg9[%c7_15] : memref<8xf32, #tpu.memory_space<smem>>
    %c6_i32 = arith.constant 6 : i32
    %39 = arith.cmpi sgt, %3, %c6_i32 : i32
    %c6 = arith.constant 6 : index
    %40 = memref.load %arg9[%c6] : memref<8xf32, #tpu.memory_space<smem>>
    %cst_16 = arith.constant 0.000000e+00 : f32
    %41 = arith.maximumf %cst_16, %29 : f32
    %42 = arith.subf %40, %41 : f32
    %cst_17 = arith.constant 0.000000e+00 : f32
    %43 = arith.maximumf %cst_17, %42 : f32
    %cst_18 = arith.constant 0.000000e+00 : f32
    %44 = arith.select %39, %43, %cst_18 : f32
    %45 = arith.subf %29, %44 : f32
    %cst_19 = arith.constant 0.000000e+00 : f32
    %46 = arith.maximumf %cst_19, %32 : f32
    %47 = arith.minimumf %44, %46 : f32
    %48 = arith.subf %32, %44 : f32
    %c0_20 = arith.constant 0 : index
    %c6_21 = arith.constant 6 : index
    %c0_22 = arith.constant 0 : index
    %49 = vector.load %arg6[%c0_20, %c6_21, %c0_22] : memref<1x8x128xf32, #tpu.memory_space<vmem>>, vector<1x1x128xf32>
    %50 = vector.shape_cast %49 : vector<1x1x128xf32> to vector<1x128xf32>
    %51 = vector.broadcast %47 : f32 to vector<1x128xf32>
    %52 = arith.mulf %51, %50 : vector<1x128xf32>
    %53 = arith.addf %37, %52 : vector<1x128xf32>
    %c6_23 = arith.constant 6 : index
    %54 = memref.load %arg9[%c6_23] : memref<8xf32, #tpu.memory_space<smem>>
    memref.store %44, %arg9[%c6_23] : memref<8xf32, #tpu.memory_space<smem>>
    %c5_i32_24 = arith.constant 5 : i32
    %55 = arith.cmpi sgt, %3, %c5_i32_24 : i32
    %c5 = arith.constant 5 : index
    %56 = memref.load %arg9[%c5] : memref<8xf32, #tpu.memory_space<smem>>
    %cst_25 = arith.constant 0.000000e+00 : f32
    %57 = arith.maximumf %cst_25, %45 : f32
    %58 = arith.subf %56, %57 : f32
    %cst_26 = arith.constant 0.000000e+00 : f32
    %59 = arith.maximumf %cst_26, %58 : f32
    %cst_27 = arith.constant 0.000000e+00 : f32
    %60 = arith.select %55, %59, %cst_27 : f32
    %61 = arith.subf %45, %60 : f32
    %cst_28 = arith.constant 0.000000e+00 : f32
    %62 = arith.maximumf %cst_28, %48 : f32
    %63 = arith.minimumf %60, %62 : f32
    %64 = arith.subf %48, %60 : f32
    %c0_29 = arith.constant 0 : index
    %c5_30 = arith.constant 5 : index
    %c0_31 = arith.constant 0 : index
    %65 = vector.load %arg6[%c0_29, %c5_30, %c0_31] : memref<1x8x128xf32, #tpu.memory_space<vmem>>, vector<1x1x128xf32>
    %66 = vector.shape_cast %65 : vector<1x1x128xf32> to vector<1x128xf32>
    %67 = vector.broadcast %63 : f32 to vector<1x128xf32>
    %68 = arith.mulf %67, %66 : vector<1x128xf32>
    %69 = arith.addf %53, %68 : vector<1x128xf32>
    %c5_32 = arith.constant 5 : index
    %70 = memref.load %arg9[%c5_32] : memref<8xf32, #tpu.memory_space<smem>>
    memref.store %60, %arg9[%c5_32] : memref<8xf32, #tpu.memory_space<smem>>
    %c4_i32 = arith.constant 4 : i32
    %71 = arith.cmpi sgt, %3, %c4_i32 : i32
    %c4 = arith.constant 4 : index
    %72 = memref.load %arg9[%c4] : memref<8xf32, #tpu.memory_space<smem>>
    %cst_33 = arith.constant 0.000000e+00 : f32
    %73 = arith.maximumf %cst_33, %61 : f32
    %74 = arith.subf %72, %73 : f32
    %cst_34 = arith.constant 0.000000e+00 : f32
    %75 = arith.maximumf %cst_34, %74 : f32
    %cst_35 = arith.constant 0.000000e+00 : f32
    %76 = arith.select %71, %75, %cst_35 : f32
    %77 = arith.subf %61, %76 : f32
    %cst_36 = arith.constant 0.000000e+00 : f32
    %78 = arith.maximumf %cst_36, %64 : f32
    %79 = arith.minimumf %76, %78 : f32
    %80 = arith.subf %64, %76 : f32
    %c0_37 = arith.constant 0 : index
    %c4_38 = arith.constant 4 : index
    %c0_39 = arith.constant 0 : index
    %81 = vector.load %arg6[%c0_37, %c4_38, %c0_39] : memref<1x8x128xf32, #tpu.memory_space<vmem>>, vector<1x1x128xf32>
    %82 = vector.shape_cast %81 : vector<1x1x128xf32> to vector<1x128xf32>
    %83 = vector.broadcast %79 : f32 to vector<1x128xf32>
    %84 = arith.mulf %83, %82 : vector<1x128xf32>
    %85 = arith.addf %69, %84 : vector<1x128xf32>
    %c4_40 = arith.constant 4 : index
    %86 = memref.load %arg9[%c4_40] : memref<8xf32, #tpu.memory_space<smem>>
    memref.store %76, %arg9[%c4_40] : memref<8xf32, #tpu.memory_space<smem>>
    %c3_i32_41 = arith.constant 3 : i32
    %87 = arith.cmpi sgt, %3, %c3_i32_41 : i32
    %c3 = arith.constant 3 : index
    %88 = memref.load %arg9[%c3] : memref<8xf32, #tpu.memory_space<smem>>
    %cst_42 = arith.constant 0.000000e+00 : f32
    %89 = arith.maximumf %cst_42, %77 : f32
    %90 = arith.subf %88, %89 : f32
    %cst_43 = arith.constant 0.000000e+00 : f32
    %91 = arith.maximumf %cst_43, %90 : f32
    %cst_44 = arith.constant 0.000000e+00 : f32
    %92 = arith.select %87, %91, %cst_44 : f32
    %93 = arith.subf %77, %92 : f32
    %cst_45 = arith.constant 0.000000e+00 : f32
    %94 = arith.maximumf %cst_45, %80 : f32
    %95 = arith.minimumf %92, %94 : f32
    %96 = arith.subf %80, %92 : f32
    %c0_46 = arith.constant 0 : index
    %c3_47 = arith.constant 3 : index
    %c0_48 = arith.constant 0 : index
    %97 = vector.load %arg6[%c0_46, %c3_47, %c0_48] : memref<1x8x128xf32, #tpu.memory_space<vmem>>, vector<1x1x128xf32>
    %98 = vector.shape_cast %97 : vector<1x1x128xf32> to vector<1x128xf32>
    %99 = vector.broadcast %95 : f32 to vector<1x128xf32>
    %100 = arith.mulf %99, %98 : vector<1x128xf32>
    %101 = arith.addf %85, %100 : vector<1x128xf32>
    %c3_49 = arith.constant 3 : index
    %102 = memref.load %arg9[%c3_49] : memref<8xf32, #tpu.memory_space<smem>>
    memref.store %92, %arg9[%c3_49] : memref<8xf32, #tpu.memory_space<smem>>
    %c2_i32_50 = arith.constant 2 : i32
    %103 = arith.cmpi sgt, %3, %c2_i32_50 : i32
    %c2 = arith.constant 2 : index
    %104 = memref.load %arg9[%c2] : memref<8xf32, #tpu.memory_space<smem>>
    %cst_51 = arith.constant 0.000000e+00 : f32
    %105 = arith.maximumf %cst_51, %93 : f32
    %106 = arith.subf %104, %105 : f32
    %cst_52 = arith.constant 0.000000e+00 : f32
    %107 = arith.maximumf %cst_52, %106 : f32
    %cst_53 = arith.constant 0.000000e+00 : f32
    %108 = arith.select %103, %107, %cst_53 : f32
    %109 = arith.subf %93, %108 : f32
    %cst_54 = arith.constant 0.000000e+00 : f32
    %110 = arith.maximumf %cst_54, %96 : f32
    %111 = arith.minimumf %108, %110 : f32
    %112 = arith.subf %96, %108 : f32
    %c0_55 = arith.constant 0 : index
    %c2_56 = arith.constant 2 : index
    %c0_57 = arith.constant 0 : index
    %113 = vector.load %arg6[%c0_55, %c2_56, %c0_57] : memref<1x8x128xf32, #tpu.memory_space<vmem>>, vector<1x1x128xf32>
    %114 = vector.shape_cast %113 : vector<1x1x128xf32> to vector<1x128xf32>
    %115 = vector.broadcast %111 : f32 to vector<1x128xf32>
    %116 = arith.mulf %115, %114 : vector<1x128xf32>
    %117 = arith.addf %101, %116 : vector<1x128xf32>
    %c2_58 = arith.constant 2 : index
    %118 = memref.load %arg9[%c2_58] : memref<8xf32, #tpu.memory_space<smem>>
    memref.store %108, %arg9[%c2_58] : memref<8xf32, #tpu.memory_space<smem>>
    %c1_i32_59 = arith.constant 1 : i32
    %119 = arith.cmpi sgt, %3, %c1_i32_59 : i32
    %c1 = arith.constant 1 : index
    %120 = memref.load %arg9[%c1] : memref<8xf32, #tpu.memory_space<smem>>
    %cst_60 = arith.constant 0.000000e+00 : f32
    %121 = arith.maximumf %cst_60, %109 : f32
    %122 = arith.subf %120, %121 : f32
    %cst_61 = arith.constant 0.000000e+00 : f32
    %123 = arith.maximumf %cst_61, %122 : f32
    %cst_62 = arith.constant 0.000000e+00 : f32
    %124 = arith.select %119, %123, %cst_62 : f32
    %125 = arith.subf %109, %124 : f32
    %cst_63 = arith.constant 0.000000e+00 : f32
    %126 = arith.maximumf %cst_63, %112 : f32
    %127 = arith.minimumf %124, %126 : f32
    %128 = arith.subf %112, %124 : f32
    %c0_64 = arith.constant 0 : index
    %c1_65 = arith.constant 1 : index
    %c0_66 = arith.constant 0 : index
    %129 = vector.load %arg6[%c0_64, %c1_65, %c0_66] : memref<1x8x128xf32, #tpu.memory_space<vmem>>, vector<1x1x128xf32>
    %130 = vector.shape_cast %129 : vector<1x1x128xf32> to vector<1x128xf32>
    %131 = vector.broadcast %127 : f32 to vector<1x128xf32>
    %132 = arith.mulf %131, %130 : vector<1x128xf32>
    %133 = arith.addf %117, %132 : vector<1x128xf32>
    %c1_67 = arith.constant 1 : index
    %134 = memref.load %arg9[%c1_67] : memref<8xf32, #tpu.memory_space<smem>>
    memref.store %124, %arg9[%c1_67] : memref<8xf32, #tpu.memory_space<smem>>
    %c0_i32_68 = arith.constant 0 : i32
    %135 = arith.cmpi sgt, %3, %c0_i32_68 : i32
    %c0_69 = arith.constant 0 : index
    %136 = memref.load %arg9[%c0_69] : memref<8xf32, #tpu.memory_space<smem>>
    %cst_70 = arith.constant 0.000000e+00 : f32
    %137 = arith.maximumf %cst_70, %125 : f32
    %138 = arith.subf %136, %137 : f32
    %cst_71 = arith.constant 0.000000e+00 : f32
    %139 = arith.maximumf %cst_71, %138 : f32
    %cst_72 = arith.constant 0.000000e+00 : f32
    %140 = arith.select %135, %139, %cst_72 : f32
    %cst_73 = arith.constant 0.000000e+00 : f32
    %141 = arith.maximumf %cst_73, %128 : f32
    %142 = arith.minimumf %140, %141 : f32
    %c0_74 = arith.constant 0 : index
    %c0_75 = arith.constant 0 : index
    %c0_76 = arith.constant 0 : index
    %143 = vector.load %arg6[%c0_74, %c0_75, %c0_76] : memref<1x8x128xf32, #tpu.memory_space<vmem>>, vector<1x1x128xf32>
    %144 = vector.shape_cast %143 : vector<1x1x128xf32> to vector<1x128xf32>
    %145 = vector.broadcast %142 : f32 to vector<1x128xf32>
    %146 = arith.mulf %145, %144 : vector<1x128xf32>
    %147 = arith.addf %133, %146 : vector<1x128xf32>
    %c0_77 = arith.constant 0 : index
    %148 = memref.load %arg9[%c0_77] : memref<8xf32, #tpu.memory_space<smem>>
    memref.store %140, %arg9[%c0_77] : memref<8xf32, #tpu.memory_space<smem>>
    %149 = arith.index_cast %3 : i32 to index
    %150 = memref.load %arg9[%149] : memref<8xf32, #tpu.memory_space<smem>>
    memref.store %8, %arg9[%149] : memref<8xf32, #tpu.memory_space<smem>>
    %151 = vector.shape_cast %147 : vector<1x128xf32> to vector<1x1x1x128xf32>
    %c0_78 = arith.constant 0 : index
    %c0_79 = arith.constant 0 : index
    %c0_80 = arith.constant 0 : index
    %c0_81 = arith.constant 0 : index
    %152 = vector.load %arg8[%c0_78, %c0_79, %c0_80, %c0_81] : memref<1x1x1x128xf32, #tpu.memory_space<vmem>>, vector<1x1x1x128xf32>
    tpu.vector_store %arg8[%c0_78, %c0_79, %c0_80, %c0_81], %151 {strides = array<i32>} : memref<1x1x1x128xf32, #tpu.memory_space<vmem>>, vector<1x1x1x128xf32>,
    %c4_i32_82 = arith.constant 4 : i32
    %153 = arith.cmpi eq, %arg1, %c4_i32_82 : i32
    %154 = arith.extui %153 : i1 to i32
    %c0_i32_83 = arith.constant 0 : i32
    %155 = arith.cmpi ne, %154, %c0_i32_83 : i32
    scf.if %155 {
      %156 = tpu.iota {dimensions = array<i32: 2>} : vector<1x1x8xi32>
      %cst_84 = arith.constant 0.000000e+00 : f32
      %157 = vector.broadcast %cst_84 : f32 to vector<1x1x8xf32>
      %c0_i32_85 = arith.constant 0 : i32
      %158 = vector.broadcast %c0_i32_85 : i32 to vector<1x1x8xi32>
      %159 = arith.cmpi eq, %156, %158 : vector<1x1x8xi32>
      %160 = vector.broadcast %140 : f32 to vector<1x1x8xf32>
      %161 = arith.select %159, %160, %157 : vector<1x1x8xi1>, vector<1x1x8xf32>
      %c1_i32_86 = arith.constant 1 : i32
      %162 = vector.broadcast %c1_i32_86 : i32 to vector<1x1x8xi32>
      %163 = arith.cmpi eq, %156, %162 : vector<1x1x8xi32>
      %164 = vector.broadcast %124 : f32 to vector<1x1x8xf32>
      %165 = arith.select %163, %164, %161 : vector<1x1x8xi1>, vector<1x1x8xf32>
      %c2_i32_87 = arith.constant 2 : i32
      %166 = vector.broadcast %c2_i32_87 : i32 to vector<1x1x8xi32>
      %167 = arith.cmpi eq, %156, %166 : vector<1x1x8xi32>
      %168 = vector.broadcast %108 : f32 to vector<1x1x8xf32>
      %169 = arith.select %167, %168, %165 : vector<1x1x8xi1>, vector<1x1x8xf32>
      %c3_i32_88 = arith.constant 3 : i32
      %170 = vector.broadcast %c3_i32_88 : i32 to vector<1x1x8xi32>
      %171 = arith.cmpi eq, %156, %170 : vector<1x1x8xi32>
      %172 = vector.broadcast %92 : f32 to vector<1x1x8xf32>
      %173 = arith.select %171, %172, %169 : vector<1x1x8xi1>, vector<1x1x8xf32>
      %c4_i32_89 = arith.constant 4 : i32
      %174 = vector.broadcast %c4_i32_89 : i32 to vector<1x1x8xi32>
      %175 = arith.cmpi eq, %156, %174 : vector<1x1x8xi32>
      %176 = vector.broadcast %76 : f32 to vector<1x1x8xf32>
      %177 = arith.select %175, %176, %173 : vector<1x1x8xi1>, vector<1x1x8xf32>
      %c5_i32_90 = arith.constant 5 : i32
      %178 = vector.broadcast %c5_i32_90 : i32 to vector<1x1x8xi32>
      %179 = arith.cmpi eq, %156, %178 : vector<1x1x8xi32>
      %180 = vector.broadcast %60 : f32 to vector<1x1x8xf32>
      %181 = arith.select %179, %180, %177 : vector<1x1x8xi1>, vector<1x1x8xf32>
      %c6_i32_91 = arith.constant 6 : i32
      %182 = vector.broadcast %c6_i32_91 : i32 to vector<1x1x8xi32>
      %183 = arith.cmpi eq, %156, %182 : vector<1x1x8xi32>
      %184 = vector.broadcast %44 : f32 to vector<1x1x8xf32>
      %185 = arith.select %183, %184, %181 : vector<1x1x8xi1>, vector<1x1x8xf32>
      %c7_i32_92 = arith.constant 7 : i32
      %186 = vector.broadcast %c7_i32_92 : i32 to vector<1x1x8xi32>
      %187 = arith.cmpi eq, %156, %186 : vector<1x1x8xi32>
      %188 = vector.broadcast %28 : f32 to vector<1x1x8xf32>
      %189 = arith.select %187, %188, %185 : vector<1x1x8xi1>, vector<1x1x8xf32>
      %190 = vector.broadcast %3 : i32 to vector<1x1x8xi32>
      %191 = arith.cmpi eq, %156, %190 : vector<1x1x8xi32>
      %192 = vector.broadcast %8 : f32 to vector<1x1x8xf32>
      %193 = arith.select %191, %192, %189 : vector<1x1x8xi1>, vector<1x1x8xf32>
      %c0_93 = arith.constant 0 : index
      %c0_94 = arith.constant 0 : index
      %c0_95 = arith.constant 0 : index
      %194 = vector.load %arg7[%c0_93, %c0_94, %c0_95] : memref<1x1x8xf32, #tpu.memory_space<vmem>>, vector<1x1x8xf32>
      tpu.vector_store %arg7[%c0_93, %c0_94, %c0_95], %193 {strides = array<i32>} : memref<1x1x8xf32, #tpu.memory_space<vmem>>, vector<1x1x8xf32>,
    } else {
    }
    return
  }
  func.func @transform_0(%arg0: i32, %arg1: i32) -> i32 {
    %c0_i32 = arith.constant 0 : i32
    %c0_i32_0 = arith.constant 0 : i32
    return %c0_i32 : i32
  }
  func.func @transform_1(%arg0: i32, %arg1: i32) -> i32 {
    %c0_i32 = arith.constant 0 : i32
    %c0_i32_0 = arith.constant 0 : i32
    return %c0_i32 : i32
  }
  func.func @transform_2(%arg0: i32, %arg1: i32) -> (i32, i32, i32) {
    %c0_i32 = arith.constant 0 : i32
    %c0_i32_0 = arith.constant 0 : i32
    %c0_i32_1 = arith.constant 0 : i32
    return %arg0, %c0_i32, %c0_i32_0 : i32, i32, i32
  }
  func.func @transform_3(%arg0: i32, %arg1: i32) -> (i32, i32, i32, i32) {
    %c0_i32 = arith.constant 0 : i32
    %c0_i32_0 = arith.constant 0 : i32
    %c0_i32_1 = arith.constant 0 : i32
    return %arg0, %arg1, %c0_i32, %c0_i32_0 : i32, i32, i32, i32
  }
  func.func @transform_4(%arg0: i32, %arg1: i32) -> (i32, i32, i32) {
    %c0_i32 = arith.constant 0 : i32
    %c0_i32_0 = arith.constant 0 : i32
    %c0_i32_1 = arith.constant 0 : i32
    return %arg0, %c0_i32, %c0_i32_0 : i32, i32, i32
  }
  func.func @transform_5(%arg0: i32, %arg1: i32) -> (i32, i32, i32) {
    %c0_i32 = arith.constant 0 : i32
    %c0_i32_0 = arith.constant 0 : i32
    %c0_i32_1 = arith.constant 0 : i32
    return %arg0, %c0_i32, %c0_i32_0 : i32, i32, i32
  }
  func.func @transform_6(%arg0: i32, %arg1: i32) -> (i32, i32, i32, i32) {
    %c0_i32 = arith.constant 0 : i32
    %c0_i32_0 = arith.constant 0 : i32
    %c0_i32_1 = arith.constant 0 : i32
    return %arg0, %arg1, %c0_i32, %c0_i32_0 : i32, i32, i32, i32
  }
}

</mosaic_0001>

<bundles_post_ra>
// kernel: tpu_custom_call.1
= control target key start
LH: loop header
LB: loop body
LE: loop exit
PB: predicated region body
PF: predicated region fallthrough
CT: control target
= control target key end

     0   :  { %s1680_s0 = inlined_call_operand.vmem [shape: f32[20], index: 0, kind: input, shape index: {}]   ;;  %s1681_s1 = inlined_call_operand.vmem [shape: f32[16], index: 1, kind: input, shape index: {}]   ;;  %s1682_s2 = inlined_call_operand.hbm [shape: f32[2,8,128], index: 2, kind: input, shape index: {}, may-alias: {2,4}]   ;;  %s1683_s3 = inlined_call_operand.vmem [shape: f32[2,5,1,128], index: 3, kind: input, shape index: {}]   ;;  %s1684_s4 = inlined_call_operand.hbm [shape: f32[2,8,128], index: 4, kind: output, shape index: {0}, may-alias: {2,4}]   ;;  %s1685_s5 = inlined_call_operand.hbm [shape: f32[2,1,8], index: 5, kind: output, shape index: {1}]   ;;  %s1686_s6 = inlined_call_operand.hbm [shape: f32[2,5,1,128], index: 6, kind: output, shape index: {2}]  }
   0x1   :  { %1705 = sst [smem:[#allocation34_spill]] %s1680_s0 }
   0x2   :  { %1706 = sst [smem:[#allocation35_spill]] %s1681_s1 }
   0x3   :  { %1707 = sst [smem:[#allocation36_spill]] %s1682_s2 }
   0x4   :  { %1708 = sst [smem:[#allocation37_spill]] %s1683_s3 }
   0x5   :  { %1709 = sst [smem:[#allocation38_spill]] %s1684_s4 }
   0x6   :  { %1710 = sst [smem:[#allocation39_spill]] %s1685_s5 }
   0x7   :  { %1711 = sst [smem:[#allocation40_spill]] %s1686_s6 }
   0x8   :  { %12 = vsyncpa [#allocation6], 0 }
   0x9   :  { %13 = vsyncpa [#allocation8], 0 }
   0xa   :  { %14 = vsyncpa [#allocation4], 0 }
   0xb   :  { %16 = vsyncpa [#allocation4 + $0x1], 0 }
   0xc   :  { %17 = vsyncpa [#allocation5], 0 }
   0xd   :  { %19 = vsyncpa [#allocation5 + $0x1], 0 }
   0xe   :  { %20 = vsyncpa [#allocation12], 0 }
   0xf   :  { %22 = vsyncpa [#allocation12 + $0x1], 0  ;;  %s1261_s21 = smov 0   ;;  %s1263_s22 = smov 0  }
  0x10   :  { %s1265_s23 = smov 0   ;;  %s1267_s24 = smov 0  }
  0x11   :  { %s1269_s25 = smov 0   ;;  %s1271_s26 = smov 0  }
  0x12   :  { %s1273_s27 = smov 0   ;;  %s1275_s28 = smov 0  }
  0x13   :  { %s1277_s29 = smov 0   ;;  %s1279_s30 = smov 0  }
  0x14   :  { %s1281_s7 = smov 0  }
  0x15 LB: > { %1712 = sst [smem:[#allocation20_spill]] %s1188_s23  ;;  %s1315_s8 = sadd.s32 4294967295, %s1220_s7   ;;  %s1220_s7 = sphi %s1281_s7, %s28_s7   ;;  %s1216_s30 = sphi %s1279_s30, %s1761_s30   ;;  %s1212_s29 = sphi %s1277_s29, %s1757_s29   ;;  %s1208_s28 = sphi %s1275_s28, %s1756_s28   ;;  %s1204_s27 = sphi %s1273_s27, %s1755_s27   ;;  %s1200_s26 = sphi %s1271_s26, %s1754_s26   ;;  %s1196_s25 = sphi %s1269_s25, %s1753_s25   ;;  %s1192_s24 = sphi %s1267_s24, %s1752_s24   ;;  %s1188_s23 = sphi %s1265_s23, %s1751_s23   ;;  %s1184_s22 = sphi %s1263_s22, %s1760_s22   ;;  %s1180_s21 = sphi %s1261_s21, %s1759_s21  }
  0x16   : > { %1713 = sst [smem:[#allocation21_spill]] %s1192_s24  ;;  %s1687_s9 = sadd.s32 4294967294, %s1220_s7  }
  0x17   : > { %1714 = sst [smem:[#allocation22_spill]] %s1196_s25  ;;  %p102_p0 = scmp.ne.s32.totalorder %s1196_s25, %s1192_s24 }
  0x18   : > { %1715 = sst [smem:[#allocation23_spill]] %s1200_s26  ;;  %p103_p1 = scmp.eq.s32.totalorder %s1315_s8, 0 }
  0x19   : > { %1716 = sst [smem:[#allocation24_spill]] %s1212_s29  ;;  %p154_p2 = scmp.eq.s32.totalorder %s1315_s8, 9 }
  0x1a   : > { %1717 = sst [smem:[#allocation25_spill]] %s1216_s30  ;;  %p160_p3 = scmp.eq.s32.totalorder %s1687_s9, 9 }
  0x1b   : > { %p1326_p4 = por %p103_p1, %p102_p0  ;;  %p207_p6 = scmp.ne.s32.totalorder %s1188_s23, %s1184_s22 }
  0x1c   : > { %p1330_p5 = por %p160_p3, %p102_p0  ;;  %p213_p7 = scmp.ne.s32.totalorder %s1184_s22, %s1180_s21 }
  0x1d   : > { %p802_p8 = scmp.ge.s32.totalorder %s1220_s7, 1  ;;  %p1340_p9 = por %p207_p6, %p154_p2 }
  0x1e   : > { %s1719_s11 = scalar_select %p1330_p5, 1, 0 }
  0x1f   : > { %s1721_s12 = scalar_select %p1340_p9, 1, 0 }
  0x20   : > { %1720 = sst [smem:[#allocation26_spill]] %s1719_s11  ;;  %p221_p10 = scmp.lt.s32.totalorder %s1220_s7, 11 }
  0x21   : > { %1722 = sst [smem:[#allocation27_spill]] %s1721_s12  ;;  %p1345_p11 = por %p213_p7, %p160_p3 }
  0x22   : > { %p1349_p12 = pnand %p802_p8, %p221_p10  ;;  %s1726_s0 = sld [smem:[#allocation34_spill]] }
  0x23   : > { %s1723_s13 = scalar_select %p1345_p11, 1, 0 }
  0x24   : > { %p847_p13 = pneg %p1349_p12  ;;  %s1727_s1 = sld [smem:[#allocation35_spill]] }
  0x25   : > { %1724 = sst [smem:[#allocation28_spill]] %s1723_s13  ;;  %s1222_s21 = smov [#allocation3]  }
  0x26   : > { %p848_p0 = pnand %p847_p13, %p103_p1  ;;  %s1223_s15 = smov [#allocation7]  }
  0x27   : > { %s37_s16 = sadd.s32 1, %s1212_s29  ;;  %s40_s9 = sadd.s32 1, %s1216_s30 }
  0x28   : > { %s233_s17 = sshll.u32 %s1726_s0, 4  ;;  %p38_p3 = scmp.ge.s32.totalorder %s37_s16, 5  ;;  %s234_s17 = int_to_ptr.vmem [resolvable:$true] %s233_s17 }
  0x29   : > { %850 = dma.vmem_to_smem (!%p848_p0), %s234_s17, 16, %s1222_s21, [#allocation6]  }
  0x2a   : > { %s243_s20 = sshll.u32 %s1727_s1, 4  ;;  %s197_s0 = sadd.s32 1, %s1188_s23  ;;  %s244_s20 = int_to_ptr.vmem [resolvable:$true] %s243_s20 }
  0x2b   : > { %853 = dma.vmem_to_smem (!%p848_p0), %s244_s20, 16, %s1223_s15, [#allocation8]  }
  0x2c   : > { %p96_p6 = scmp.ne.s32.totalorder %s1200_s26, %s1196_s25  ;;  %s1763_s16 = smov (%p38_p3, %s37_s16), 0 }
  0x2d   : > { %1728 = sst [smem:[#allocation29_spill]] %s1763_s16  ;;  %s1765_s9 = smov (!%p38_p3, %s40_s9), %s1216_s30 }
  0x2e   : > { %p97_p7 = scmp.eq.s32.totalorder %s1220_s7, 0  ;;  %p1374_p8 = por %p154_p2, %p96_p6 }
  0x2f   : > { %p42_p10 = scmp.ge.s32.totalorder %s1765_s9, 2  ;;  %s89_s18 = sadd.s32 1, %s1200_s26 }
  0x30   : > { %s1729_s17 = scalar_select %p1374_p8, 1, 0 }
  0x31   : > { %p1379_p13 = por %p97_p7, %p96_p6  ;;  %s193_s20 = ssub.s32 %s1212_s29, %s1763_s16 }
  0x32   : > { %1730 = sst [smem:[#allocation30_spill]] %s1729_s17  ;;  %s1767_s9 = smov (%p42_p10, %s1765_s9), 0 }
  0x33   : > { %1732 = sst [smem:[#allocation31_spill]] %s1767_s9  ;;  %p870_p0 = scmp.lt.s32.totalorder %s1220_s7, 10 }
  0x34   : > { %s254_s21 = sand.u32 1, %s1200_s26   ;;  %s86_s15 = ssub.s32 %s1216_s30, %s1767_s9 }
  0x35   : > { %s807_s1 = sshll.u32 %s1216_s30, 3  ;;  %p87_p2 = scmp.eq.s32.totalorder %s86_s15, 0 }
  0x36   : > { %s194_s13 = sor.u32 %s193_s20, %s86_s15  ;;  %s806_s11 = sshll.u32 %s254_s21, 3 }
  0x37   : > { %p195_p3 = scmp.eq.s32.totalorder %s194_s13, 0  ;;  %s1735_s2 = sld [smem:[#allocation36_spill]] }
  0x38   : > { %s1393_s24 = scalar_select %p87_p2, %s1200_s26, %s89_s18  }
  0x39   : > { %s1396_s12 = scalar_select %p195_p3, %s1188_s23, %s197_s0  }
  0x3a   : > { %1733 = sst [smem:[#allocation32_spill]] %s1393_s24  ;;  %s258_s5 = scalar_lea.vmem [#allocation9], %s806_s11 }
  0x3b   : > { %1734 = sst [smem:[#allocation33_spill]] %s1396_s12  ;;  %s266_s17 = sshll.u32 %s258_s5, 4  ;;  %s267_s17 = int_to_ptr.vmem [resolvable:$true] %s266_s17 }
  0x3c   : > { %p855_p6 = pnand %p870_p0, %p1379_p13  ;;  %s255_s9 = scalar_lea.sflag [#allocation4], %s254_s21 }
  0x3d   : > { %s262_s16 = scalar_lea.hbm %s1735_s2, %s807_s1  ;;  %285 = sbr.rel (%p1349_p12) target bundleno = 244 (0xf4), region = 36 }
  0x3e   : > { %s264_s29 = sshll.u32 %s262_s16, 4  ;;  %s265_s29 = int_to_ptr.hbm [resolvable:$true] %s264_s29 }
  0x3f   : > { %857 = dma.hbm_to_vmem [thread:$0]  (!%p855_p6), %s265_s29, 128, %s267_s17, %s255_s9  }
  0x42   : > { %1155 = dma.done.wait (%p103_p1), [#allocation6], 16  }
  0x43   : > { %1157 = vsyncadd (%p103_p1), [#allocation6], 4294967280 }
  0x44   : > { %1159 = dma.done.wait (%p103_p1), [#allocation8], 16  }
  0x45   : > { %1161 = vsyncadd (%p103_p1), [#allocation8], 4294967280  ;;  %s1416_s0 = sand.u32 1, %s1196_s25  }
  0x46   : > { %s811_s1 = sshll.u32 %s1416_s0, 3  ;;  %s298_s4 = scalar_lea.sflag [#allocation4], %s1416_s0 }
  0x47   : > { %s301_s5 = scalar_lea.vmem [#allocation9], %s811_s1 }
  0x48   : > { %1163 = dma.done.wait (%p1326_p4), %s298_s4, 128  }
  0x49   : > { %1165 = vsyncadd (%p1326_p4), %s298_s4, 4294967168 }
  0x4a   : > { %307 = sfence }
  0x4b   : > { %s345_s6 = sand.u32 1, %s1184_s22   ;;  %p347_p1 = scmp.lt.s32.totalorder %s1208_s28, 1 }
  0x4c   : > { %p349_p12 = scmp.lt.s32.totalorder %s1204_s27, 4  ;;  %s1435_s17 = scalar_lea.vmem [#allocation10], %s811_s1 }
  0x4d   : > { %s348_s29 = scalar_select %p347_p1, %s1208_s28, 1 }
  0x4e   : > { %s350_s9 = scalar_select %p349_p12, %s1204_s27, 4 }
  0x4f   : > { %s829_s11 = smul.u32 5, %s348_s29  ;;  %s1438_s19 = scalar_lea.vmem [#allocation13], %s345_s6 }
  0x50   : > { %p813_p4 = scmp.ne.s32.totalorder %s1204_s27, 0 }
  0x51   : > { %s1429_s13 = sadd.s32 %s829_s11, %s350_s9  ;;  %s814_s20 = sshll.u32 (!%p813_p4), %s1208_s28, 3 }
  0x52   : > { %357 = sbr.rel (%p813_p4) target bundleno = 103 (0x67), region = 52  ;;  %s361_s21 = sld [smem:[#allocation7 + %s814_s20]] (!%p813_p4) }
  0x53   : > { %s364_s15 = sadd.s32 (!%p813_p4), 1, %s814_s20  ;;  %s368_s29 = sadd.s32 (!%p813_p4), 2, %s814_s20 }
  0x54   : > { %s365_s4 = sld [smem:[#allocation7 + %s364_s15]] (!%p813_p4)  ;;  %s372_s11 = sadd.s32 (!%p813_p4), 3, %s814_s20 }
  0x55   : > { %s369_s9 = sld [smem:[#allocation7 + %s368_s29]] (!%p813_p4)  ;;  %s376_s1 = sadd.s32 (!%p813_p4), 4, %s814_s20 }
  0x56   : > { %s373_s14 = sld [smem:[#allocation7 + %s372_s11]] (!%p813_p4)  ;;  %s380_s18 = sadd.s32 (!%p813_p4), 5, %s814_s20 }
  0x57   : > { %v358_v0 = vld [vmem:[%s301_s5] sm:$0xff]  ;;  %s377_s16 = sld [smem:[#allocation7 + %s376_s1]]  ;;  %s384_s5 = sadd.s32 6, %s814_s20 }
  0x58   : > { %359 = vst [vmem:[%s1435_s17] sm:$0xff] %v358_v0  ;;  %s381_s6 = sld [smem:[#allocation7 + %s380_s18]]  ;;  %s388_s10 = sadd.s32 7, %s814_s20 }
  0x59   : > { %363 = sst [smem:[#allocation2]] %s361_s21 }
  0x5a   : > { %367 = sst [smem:[#allocation2 + $0x1]] %s365_s4 }
  0x5b   : > { %371 = sst [smem:[#allocation2 + $0x2]] %s369_s9 }
  0x5c   : > { %375 = sst [smem:[#allocation2 + $0x3]] %s373_s14 }
  0x5d   : > { %379 = sst [smem:[#allocation2 + $0x4]] %s377_s16 }
  0x5e   : > { %383 = sst [smem:[#allocation2 + $0x5]] %s381_s6 }
  0x5f   : > { %s385_s2 = sld [smem:[#allocation7 + %s384_s5]] }
  0x60   : > { %s389_s30 = sld [smem:[#allocation7 + %s388_s10]] }
  0x65   : > { %387 = sst [smem:[#allocation2 + $0x6]] %s385_s2 }
  0x66   : > { %391 = sst [smem:[#allocation2 + $0x7]] %s389_s30 }
  0x67 PF: > { %s393_s18 = smul.u32 5, %s1208_s28  ;;  %s1737_s3 = sld [smem:[#allocation37_spill]] }
  0x68   : > { %s699_s20 = scalar_lea.vmem %s1435_s17, %s1204_s27 [#allocation10]  ;;  %s817_s10 = sld [smem:[#allocation2 + $0x7]] }
  0x69   : > { %s1454_s29 = sadd.s32 %s1204_s27, %s393_s18  ;;  %s1459_s11 = sadd.s32 3, %s1204_s27 }
  0x6a   : > { %s815_s2 = sshll.u32 %s1454_s29, 1  ;;  %p406_p7 = scmp.gt.s32.totalorder %s1459_s11, 7 }
  0x6b   : > { %s397_s30 = sadd.s32 1, %s815_s2  ;;  %s1224_s14 = smov 0.0  }
  0x6c   : > { %s398_s9 = sld [smem:[#allocation3 + %s397_s30]]  ;;  %p422_p10 = scmp.gt.s32.totalorder %s1459_s11, 6 }
  0x6d   : > { %s1738_s4 = scalar_lea.vmem %s1737_s3, %s1429_s13  ;;  %s818_s1 = sld [smem:[#allocation2 + $0x6]] }
  0x6e   : > { %v1449_v1 = vld [vmem:[%s1738_s4] sm:$0x1]  ;;  %s819_s18 = sld [smem:[#allocation2 + $0x5]]  ;;  %p438_p13 = scmp.gt.s32.totalorder %s1459_s11, 5 }
  0x6f   : > { %816 = vst [vmem:[%s699_s20 + $0x3] sm:$0x1] %v1449_v1  ;;  %s1470_s4 = sld [smem:[#allocation3 + %s815_s2]]  ;;  %p454_p0 = scmp.gt.s32.totalorder %s1459_s11, 4 }
  0x70   : > { %p470_p2 = scmp.gt.s32.totalorder %s1459_s11, 3  ;;  %s1507_s23 = sld [smem:[#allocation2 + $0x1]] }
  0x71   : > { %p486_p3 = scmp.gt.s32.totalorder %s1459_s11, 2  ;;  %p502_p6 = scmp.gt.s32.totalorder %s1459_s11, 1 }
  0x72   : > { %s408_s13 = smax.f32 %s1224_s14, %s398_s9  ;;  %p518_p1 = scmp.gt.s32.totalorder %s1459_s11, 0 }
  0x73   : > { %s409_s16 = ssub.f32 %s817_s10, %s408_s13  ;;  %p824_p12 = scmp.ne.s32.totalorder %s1204_s27, 4 }
  0x74   : > { %s820_s10 = sld [smem:[#allocation2 + $0x4]] }
  0x75   : > { %s410_s6 = smax.f32 %s1224_s14, %s409_s16  ;;  %s1483_s16 = sld [smem:[#allocation2 + $0x3]] }
  0x76   : > { %s1769_s6 = smov (!%p406_p7, %s410_s6), 0.0  ;;  %v416_v3 = vld [vmem:[%s1435_s17 + $0x7] sm:$0x1]  ;;  %v432_v7 = vld [vmem:[%s1435_s17 + $0x6] sm:$0x1] }
  0x77   : > { %s412_s5 = ssub.f32 %s398_s9, %s1769_s6  ;;  %v448_v11 = vld [vmem:[%s1435_s17 + $0x5] sm:$0x1]  ;;  %v464_v15 = vld [vmem:[%s1435_s17 + $0x4] sm:$0x1]  ;;  %v480_v19 = vld [vmem:[%s1435_s17 + $0x3] sm:$0x1] }
  0x78   : > { %421 = sst [smem:[#allocation2 + $0x7]] %s1769_s6  ;;  %v496_v23 = vld [vmem:[%s1435_s17 + $0x2] sm:$0x1]  ;;  %v512_v28 = vld [vmem:[%s1435_s17 + $0x1] sm:$0x1] }
  0x79   : > { %s424_s21 = smax.f32 %s1224_s14, %s412_s5  ;;  %v526_v31 = vld [vmem:[%s1435_s17] sm:$0x1] }
  0x7a   : > { %s425_s15 = ssub.f32 %s818_s1, %s424_s21 }
  0x7b   : > { %s405_s1 = ssub.f32 1.0, %s1470_s4 }
  0x7c   : > { %s426_s20 = smax.f32 %s1224_s14, %s425_s15 }
  0x7d   : > { %s1771_s20 = smov (!%p422_p10, %s426_s20), 0.0  ;;  %s415_s21 = ssub.f32 %s405_s1, %s1769_s6 }
  0x7e   : > { %s428_s30 = ssub.f32 %s412_s5, %s1771_s20 }
  0x7f   : > { %437 = sst [smem:[#allocation2 + $0x6]] %s1771_s20 }
  0x80   : > { %s440_s9 = smax.f32 %s1224_s14, %s428_s30  ;;  %s431_s24 = ssub.f32 %s415_s21, %s1771_s20 }
  0x81   : > { %s441_s13 = ssub.f32 %s819_s18, %s440_s9  ;;  %s1225_s9 = smov 1.0  }
  0x82   : > { %s402_s3 = smin.f32 %s1225_s9, %s1470_s4 }
  0x83   : > { %s442_s2 = smax.f32 %s1224_s14, %s441_s13  ;;  %s413_s13 = smax.f32 %s1224_s14, %s405_s1  ;;  %v403_v2 = vstv %s402_s3 }
  0x84   : > { %s1773_s2 = smov (!%p438_p13, %s442_s2), 0.0  ;;  %s414_s25 = smin.f32 %s413_s13, %s1769_s6  ;;  %v404_v5 = vmul.f32 %v403_v2, %v1449_v1 }
  0x85   : > { %s444_s5 = ssub.f32 %s428_s30, %s1773_s2  ;;  %v417_v4 = vstv %s414_s25  ;;  %s445_s13 = smax.f32 %s1224_s14, %s431_s24 }
  0x86   : > { %453 = sst [smem:[#allocation2 + $0x5]] %s1773_s2  ;;  %v418_v6 = vmul.f32 %v417_v4, %v416_v3 }
  0x87   : > { %s456_s15 = smax.f32 %s1224_s14, %s444_s5  ;;  %s1497_s30 = sld [smem:[#allocation2 + $0x2]] }
  0x88   : > { %s457_s18 = ssub.f32 %s820_s10, %s456_s15  ;;  %s429_s15 = smax.f32 %s1224_s14, %s415_s21  ;;  %v419_v9 = vadd.f32 %v418_v6, %v404_v5 }
  0x89   : > { %s447_s9 = ssub.f32 %s431_s24, %s1773_s2  ;;  %s430_s12 = smin.f32 %s429_s15, %s1771_s20 }
  0x8a   : > { %s458_s26 = smax.f32 %s1224_s14, %s457_s18  ;;  %v433_v8 = vstv %s430_s12  ;;  %s446_s24 = smin.f32 %s445_s13, %s1773_s2 }
  0x8b   : > { %s1775_s26 = smov (!%p454_p0, %s458_s26), 0.0  ;;  %s461_s25 = smax.f32 %s1224_s14, %s447_s9  ;;  %v434_v10 = vmul.f32 %v433_v8, %v432_v7  ;;  %v449_v12 = vstv %s446_s24 }
  0x8c   : > { %s460_s10 = ssub.f32 %s444_s5, %s1775_s26  ;;  %v450_v14 = vmul.f32 %v449_v12, %v448_v11 }
  0x8d   : > { %469 = sst [smem:[#allocation2 + $0x4]] %s1775_s26  ;;  %v435_v13 = vadd.f32 %v434_v10, %v419_v9 }
  0x8e   : > { %s472_s1 = smax.f32 %s1224_s14, %s460_s10  ;;  %s463_s21 = ssub.f32 %s447_s9, %s1775_s26 }
  0x8f   : > { %s473_s18 = ssub.f32 %s1483_s16, %s472_s1  ;;  %s462_s1 = smin.f32 %s461_s25, %s1775_s26  ;;  %v451_v17 = vadd.f32 %v450_v14, %v435_v13 }
  0x90   : > { %v465_v16 = vstv %s462_s1 }
  0x91   : > { %s474_s5 = smax.f32 %s1224_s14, %s473_s18  ;;  %s477_s18 = smax.f32 %s1224_s14, %s463_s21  ;;  %v466_v18 = vmul.f32 %v465_v16, %v464_v15 }
  0x92   : > { %s1777_s5 = smov (!%p470_p2, %s474_s5), 0.0 }
  0x93   : > { %s476_s3 = ssub.f32 %s460_s10, %s1777_s5  ;;  %s478_s9 = smin.f32 %s477_s18, %s1777_s5  ;;  %v467_v21 = vadd.f32 %v466_v18, %v451_v17 }
  0x94   : > { %485 = sst [smem:[#allocation2 + $0x3]] %s1777_s5  ;;  %v481_v20 = vstv %s478_s9 }
  0x95   : > { %s488_s16 = smax.f32 %s1224_s14, %s476_s3  ;;  %s479_s10 = ssub.f32 %s463_s21, %s1777_s5  ;;  %v482_v22 = vmul.f32 %v481_v20, %v480_v19 }
  0x96   : > { %s489_s15 = ssub.f32 %s1497_s30, %s488_s16 }
  0x97   : > { %s1536_s30 = sld [smem:[#allocation2]]  ;;  %s493_s21 = smax.f32 %s1224_s14, %s479_s10  ;;  %v483_v26 = vadd.f32 %v482_v22, %v467_v21 }
  0x98   : > { %s490_s12 = smax.f32 %s1224_s14, %s489_s15 }
  0x99   : > { %s1779_s12 = smov (!%p486_p3, %s490_s12), 0.0 }
  0x9a   : > { %s492_s13 = ssub.f32 %s476_s3, %s1779_s12  ;;  %s494_s15 = smin.f32 %s493_s21, %s1779_s12 }
  0x9b   : > { %s1543_s24 = ssub.f32 %s479_s10, %s1779_s12  ;;  %v497_v24 = vstv %s494_s15 }
  0x9c   : > { %501 = sst [smem:[#allocation2 + $0x2]] %s1779_s12  ;;  %s504_s25 = smax.f32 %s1224_s14, %s492_s13  ;;  %v498_v27 = vmul.f32 %v497_v24, %v496_v23 }
  0x9d   : > { %s505_s16 = ssub.f32 %s1507_s23, %s504_s25  ;;  %s509_s1 = smax.f32 %s1224_s14, %s1543_s24 }
  0x9e   : > { %s701_s25 = scalar_lea.smem [#allocation2], %s1204_s27  ;;  %v499_v30 = vadd.f32 %v498_v27, %v483_v26  ;;  %s1739_s27 = scalar_lea.vmem (!%p824_p12), [#allocation11], %s1416_s0 }
  0x9f   : > { %s506_s3 = smax.f32 %s1224_s14, %s505_s16  ;;  %s702_s16 = scalar_lea.smem %s701_s25, 3 [#allocation2] }
  0xa0   : > { %s1781_s3 = smov (!%p502_p6, %s506_s3), 0.0 }
  0xa1   : > { %s508_s23 = ssub.f32 %s492_s13, %s1781_s3  ;;  %s510_s18 = smin.f32 %s509_s1, %s1781_s3 }
  0xa2   : > { %s511_s10 = ssub.f32 %s1543_s24, %s1781_s3  ;;  %v513_v25 = vstv %s510_s18 }
  0xa3   : > { %517 = sst [smem:[#allocation2 + $0x1]] %s1781_s3  ;;  %s520_s9 = smax.f32 %s1224_s14, %s508_s23  ;;  %v514_v29 = vmul.f32 %v513_v25, %v512_v28 }
  0xa4   : > { %s521_s21 = ssub.f32 %s1536_s30, %s520_s9  ;;  %s524_s1 = smax.f32 %s1224_s14, %s511_s10 }
  0xa5   : > { %v515_v33 = vadd.f32 %v514_v29, %v499_v30 }
  0xa6   : > { %s522_s13 = smax.f32 %s1224_s14, %s521_s21 }
  0xa7   : > { %s1783_s13 = smov (!%p518_p1, %s522_s13), 0.0 }
  0xa8   : > { %s525_s24 = smin.f32 %s524_s1, %s1783_s13  ;;  %531 = sst [smem:[#allocation2]] %s1783_s13 }
  0xa9   : > { %v527_v32 = vstv %s525_s24  ;;  %533 = sst [smem:[%s702_s16]] %s1470_s4 }
  0xaa   : > { %v528_v34 = vmul.f32 %v527_v32, %v526_v31  ;;  %538 = sbr.rel (%p824_p12) target bundleno = 190 (0xbe), region = 56 }
  0xac   : > { %v529_v35 = vadd.f32 %v528_v34, %v515_v33 }
  0xae   : > { %534 = vst [vmem:[%s1438_s19] sm:$0x1] %v529_v35 }
  0xaf   : > { %v539_v36 = vlaneseq  ;;  %v542_v38 = vstv %s1783_s13  ;;  %v545_v39 = vstv %s1781_s3  ;;  %v548_v40 = vstv %s1779_s12 }
  0xb0   : > { %v551_v42 = vstv %s1777_s5  ;;  %v554_v44 = vstv %s1775_s26  ;;  %v557_v46 = vstv %s1773_s2  ;;  %v565_v47 = vstv %s1459_s11 }
  0xb1   : > { %v540_v37 = vand.u32 127, %v539_v36  ;;  %v560_v49 = vstv %s1771_s20  ;;  %v563_v51 = vstv %s1769_s6  ;;  %v567_v53 = vstv %s1470_s4 }
  0xb2   : > { %vm569_vm9 = vcmask 57344  }
  0xb3   : > { %vm541_vm0 = vcmp.eq.s32.totalorder %v540_v37, 0  ;;  %vm544_vm1 = vcmp.eq.s32.totalorder %v540_v37, 1  ;;  %vm547_vm2 = vcmp.eq.s32.totalorder %v540_v37, 2  ;;  %vm550_vm3 = vcmp.eq.s32.totalorder %v540_v37, 3 }
  0xb4   : > { %v543_v41 = vsel %vm541_vm0, %v542_v38, 0.0  ;;  %vm553_vm4 = vcmp.eq.s32.totalorder %v540_v37, 4  ;;  %vm556_vm5 = vcmp.eq.s32.totalorder %v540_v37, 5  ;;  %vm559_vm6 = vcmp.eq.s32.totalorder %v540_v37, 6 }
  0xb5   : > { %v546_v43 = vsel %vm544_vm1, %v545_v39, %v543_v41  ;;  %vm562_vm7 = vcmp.eq.s32.totalorder %v540_v37, 7  ;;  %vm566_vm8 = vcmp.eq.s32.totalorder %v540_v37, %v565_v47 }
  0xb6   : > { %v549_v45 = vsel %vm547_vm2, %v548_v40, %v546_v43 }
  0xb7   : > { %v552_v48 = vsel %vm550_vm3, %v551_v42, %v549_v45 }
  0xb8   : > { %v555_v50 = vsel %vm553_vm4, %v554_v44, %v552_v48 }
  0xb9   : > { %v558_v52 = vsel %vm556_vm5, %v557_v46, %v555_v50 }
  0xba   : > { %v561_v54 = vsel %vm559_vm6, %v560_v49, %v558_v52 }
  0xbb   : > { %v564_v55 = vsel %vm562_vm7, %v563_v51, %v561_v54 }
  0xbc   : > { %v568_v56 = vsel %vm566_vm8, %v567_v53, %v564_v55 }
  0xbd   : > { %570 = vst.msk [vmem:[%s1739_s27] sm:$0x1] %vm569_vm9, %v568_v56 }
  0xbe PF: > { %s576_s11 = sand.u32 1, %s1315_s8   ;;  %s1741_s2 = sld [smem:[#allocation39_spill]] }
  0xbf   : > { %s1742_s6 = scalar_lea.vmem [#allocation11], %s1416_s0  ;;  %s1594_s30 = scalar_lea.sflag [#allocation12], %s576_s11 }
  0xc0   : > { %s605_s12 = sshll.u32 %s1742_s6, 4  ;;  %s606_s12 = int_to_ptr.vmem [resolvable:$true] %s605_s12 }
  0xc4   : > { %s603_s5 = scalar_lea.hbm %s1741_s2, %s1208_s28  ;;  %s1046_s18 = scalar_lea.hbm %s1741_s2, 2 }
  0xc5   : > { %s607_s4 = sshll.u32 %s603_s5, 4  ;;  %s608_s4 = int_to_ptr.hbm [resolvable:$true] %s607_s4 }
  0xc6   : > { %s1040_s15 = sshra.s32 %s608_s4, 4  ;;  %s1041_s15 = int_to_ptr.hbm [resolvable:$true] %s1040_s15 }
  0xc7   : > { %s1042_s3 = scalar_lea.hbm %s1041_s15, 1  ;;  %p1047_p13 = scmp.lt.s32.totalorder %s1041_s15, %s1741_s2 }
  0xc8   : > { %p1043_p4 = scmp.ne.s32.totalorder %s1041_s15, %s1042_s3  ;;  %p1048_p0 = scmp.lt.s32.totalorder %s1046_s18, %s1042_s3 }
  0xca   : > { %p1044_p7 = pnand %p1043_p4, %p1374_p8  ;;  %p1049_p2 = por %p1048_p0, %p1047_p13 }
  0xcc   : > { %p1045_p10 = pneg %p1044_p7 }
  0xce   : > { %p1050_p3 = pnand %p1049_p2, %p1045_p10 }
  0xd0   : > { %1053 = shalt.err (!%p1050_p3)
}
  0xd1   : > { %842 = dma.vmem_to_hbm [thread:$0]  (%p1374_p8), %s606_s12, 16, %s608_s4, %s1594_s30  }
  0xd2   : > { %s826_s21 = sshll.u32 %s1208_s28, 3  ;;  %s592_s25 = sshll.u32 %s1435_s17, 4  ;;  %s593_s25 = int_to_ptr.vmem [resolvable:$true] %s592_s25 }
  0xd3   : > { %s1743_s1 = sld [smem:[#allocation38_spill]]  ;;  %s620_s6 = sshll.u32 %s1438_s19, 4  ;;  %s621_s6 = int_to_ptr.vmem [resolvable:$true] %s620_s6 }
  0xd4   : > { %s1744_s20 = sld [smem:[#allocation40_spill]]  ;;  %s572_s15 = scalar_lea.sflag [#allocation5], %s1416_s0 }
  0xd9   : > { %s590_s24 = scalar_lea.hbm %s1743_s1, %s826_s21  ;;  %s1074_s12 = scalar_lea.hbm %s1743_s1, 16 }
  0xda   : > { %s594_s27 = sshll.u32 %s590_s24, 4  ;;  %s618_s5 = scalar_lea.hbm %s1744_s20, %s1454_s29  ;;  %s595_s27 = int_to_ptr.hbm [resolvable:$true] %s594_s27 }
  0xdb   : > { %s1068_s3 = sshra.s32 %s595_s27, 4  ;;  %s1069_s3 = int_to_ptr.hbm [resolvable:$true] %s1068_s3 }
  0xdc   : > { %s1070_s23 = scalar_lea.hbm %s1069_s3, 8  ;;  %p1075_p4 = scmp.lt.s32.totalorder %s1069_s3, %s1743_s1 }
  0xdd   : > { %p1071_p6 = scmp.ne.s32.totalorder %s1069_s3, %s1070_s23  ;;  %p1076_p7 = scmp.lt.s32.totalorder %s1074_s12, %s1070_s23 }
  0xdf   : > { %p1072_p1 = pnand %p1071_p6, %p1374_p8  ;;  %p1077_p10 = por %p1076_p7, %p1075_p4 }
  0xe1   : > { %p1073_p12 = pneg %p1072_p1 }
  0xe3   : > { %p1078_p13 = pnand %p1077_p10, %p1073_p12 }
  0xe5   : > { %1081 = shalt.err (!%p1078_p13)
}
  0xe6   : > { %841 = dma.vmem_to_hbm [thread:$0]  (%p1374_p8), %s593_s25, 128, %s595_s27, %s572_s15  }
  0xe7   : > { %s622_s19 = sshll.u32 %s618_s5, 4  ;;  %s1102_s21 = scalar_lea.hbm %s1744_s20, 10  ;;  %s623_s19 = int_to_ptr.hbm [resolvable:$true] %s622_s19 }
  0xe8   : > { %s1096_s29 = sshra.s32 %s623_s19, 4  ;;  %s1097_s29 = int_to_ptr.hbm [resolvable:$true] %s1096_s29 }
  0xe9   : > { %s1098_s18 = scalar_lea.hbm %s1097_s29, 1  ;;  %p1103_p6 = scmp.lt.s32.totalorder %s1097_s29, %s1744_s20 }
  0xea   : > { %p1099_p0 = scmp.ne.s32.totalorder %s1097_s29, %s1098_s18  ;;  %p1104_p1 = scmp.lt.s32.totalorder %s1102_s21, %s1098_s18 }
  0xec   : > { %p1100_p2 = pnand %p1099_p0, %p1340_p9  ;;  %p1105_p8 = por %p1104_p1, %p1103_p6 }
  0xee   : > { %p1101_p3 = pneg %p1100_p2 }
  0xf0   : > { %p1106_p12 = pnand %p1105_p8, %p1101_p3 }
  0xf2   : > { %1109 = shalt.err (!%p1106_p12)
}
  0xf3   : > { %843 = dma.vmem_to_hbm [thread:$0]  (%p1340_p9), %s621_s6, 16, %s623_s19, %s1594_s30  }
  0xf4 PF: > { %s1746_s26 = sld [smem:[#allocation21_spill]]  ;;  %p873_p4 = scmp.ge.s32.totalorder %s1220_s7, 2 }
  0xf6   : > { %p859_p7 = pnand %p873_p4, %p1330_p5 }
  0xf8   : > { %p860_p10 = pneg %p859_p7 }
  0xfa   : > { %s634_s24 = sand.u32 1, %s1746_s26  }
  0xfb   : > { %s635_s27 = scalar_lea.sflag [#allocation5], %s634_s24 }
  0xfc   : > { %1167 = dma.done.wait (%p860_p10), %s635_s27, 128  }
  0xfd   : > { %1169 = vsyncadd (%p860_p10), %s635_s27, 4294967168  ;;  %s1748_s11 = sadd.s32 4294967294, %s1220_s7  }
  0xfe   : > { %s644_s14 = sand.u32 1, %s1748_s11  }
  0xff   : > { %s645_s5 = scalar_lea.sflag [#allocation12], %s644_s14 }
 0x100   : > { %1171 = dma.done.wait (%p860_p10), %s645_s5, 16  }
 0x101   : > { %1173 = vsyncadd (%p860_p10), %s645_s5, 4294967280  ;;  %p865_p9 = pnand %p873_p4, %p1345_p11 }
 0x103   : > { %p866_p13 = pneg %p865_p9 }
 0x105   : > { %1175 = dma.done.wait (%p866_p13), %s645_s5, 16  }
 0x106   : > { %1177 = vsyncadd (%p866_p13), %s645_s5, 4294967280  ;;  %s28_s7 = sadd.s32 1, %s1220_s7   ;;  %s1750_s30 = sld [smem:[#allocation20_spill]] }
 0x107   : > { %p25_p0 = scmp.ge.s32.totalorder %s28_s7, 12   ;;  %s1751_s23 = sld [smem:[#allocation33_spill]] }
 0x108   : > { %s1752_s24 = sld [smem:[#allocation22_spill]]  ;;  %s1759_s21 = smov %s1184_s22 }
 0x109   : > { %s1753_s25 = sld [smem:[#allocation23_spill]] }
 0x10a   : > { %s1754_s26 = sld [smem:[#allocation32_spill]] }
 0x10b   : > { %s1755_s27 = sld [smem:[#allocation24_spill]] }
 0x10c   : > { %s1756_s28 = sld [smem:[#allocation25_spill]]  ;;  %s1760_s22 = smov %s1750_s30 }
 0x10d   : > { %s1757_s29 = sld [smem:[#allocation29_spill]] }
 0x10e   : > { %s1758_s6 = sld [smem:[#allocation31_spill]] }
 0x110   :  { %27 = sbr.rel (!%p25_p0) target bundleno = 21 (0x15), region = 151 }
 0x114   : > { %s1761_s30 = smov %s1758_s6 }
 0x115   :  { %659 = vsyncpa [#allocation4], 1 }
 0x116   :  { %661 = vsyncpa [#allocation4 + $0x1], 1 }
 0x117   :  { %662 = vsyncpa [#allocation5], 1 }
 0x118   :  { %664 = vsyncpa [#allocation5 + $0x1], 1 }
 0x119   :  { %665 = vsyncpa [#allocation12], 1 }
 0x11a   :  { %667 = vsyncpa [#allocation12 + $0x1], 1 }
 0x11b   :  { %668 = vsyncpa [#allocation6], 1 }
 0x11c   :  { %670 = vsyncpa [#allocation6 + $0x1], 1 }
 0x11d   :  { %671 = vsyncpa [#allocation8], 1 }

</bundles_post_ra>
